<compile_context>
chip_gen: v5e
topology: v5e:2x2
jax: 0.10.0
libtpu: 0.0.40
codegen_flags: <defaults>
</compile_context>

<pallas_src>
import functools

import jax
import jax.numpy as jnp
from jax import lax
from jax.experimental import pallas as pl
from jax.experimental.pallas import tpu as pltpu


def _focal_loss_kernel(gamma, C, P, tile_p, tiles_per_split, acc_lanes,
                       mask_possible,
                       logp_ref, tgt_ref, out_ref, acc_ref):
    """One (frame-block, pixel-split, pixel-tile) step of the focal-loss sum.

    logp_ref: (TN, C, TP) log-probabilities (native dtype, widened in-kernel)
    tgt_ref:  (TN, TP)    integer GT class ids (native dtype, widened in-kernel)
    out_ref:  (1, TN, 1)  f32 per-frame loss for this pixel split
    acc_ref:  (TN, acc_lanes) f32 per-lane partial sums (VMEM scratch)
    """
    s = pl.program_id(1)          # pixel split (parallel; 2nd TC on v7x)
    k = pl.program_id(2)          # pixel tile inside the split (reduction)

    @pl.when(k == 0)
    def _init():
        acc_ref[...] = jnp.zeros_like(acc_ref)

    tgt = tgt_ref[...].astype(jnp.int32)                        # (TN, TP)

    # Gather log p_t on the native (TN, C, TP) block: widen + one broadcast
    # compare against the target ids + sublane reduce over the class axis.
    # No per-class slab extraction (no sublane->frame relayout copies); the
    # class axis is processed 8 classes (one sublane tile) at a time so the
    # widened f32 temporary stays bounded for large C.
    logpt = jnp.zeros(tgt.shape, jnp.float32)
    for c0 in range(0, C, 8):
        cc = min(8, C - c0)
        if c0 == 0 and cc == C:
            blk = logp_ref[...].astype(jnp.float32)             # (TN, C, TP)
        else:
            blk = logp_ref[:, pl.ds(c0, cc), :].astype(jnp.float32)
        cls = c0 + lax.broadcasted_iota(jnp.int32, blk.shape, 1)
        logpt = logpt + jnp.sum(
            jnp.where(cls == tgt[:, None, :], blk, 0.0), axis=1)

    pt = jnp.exp(logpt)
    # gamma is a Python int -> lowers to integer_pow (a few VPU multiplies).
    loss = -1.0 * (1.0 - pt) ** gamma * logpt                   # (TN, TP)

    def _accumulate(v):
        # Fold the (TN, TP) tile into a (TN, acc_lanes<=128) accumulator with
        # lane-aligned vreg slices: tiny scratch, one VMEM RMW per step.
        part = v[:, 0:acc_lanes]
        for j in range(1, tile_p // acc_lanes):
            part = part + v[:, j * acc_lanes:(j + 1) * acc_lanes]
        acc_ref[...] += part

    if mask_possible:
        # Only the tail / duplicated (clamped index_map) tiles pay for the
        # lane mask; interior tiles take the plain accumulate path.
        gt_tile = s * tiles_per_split + k      # UNclamped global tile index
        is_tail = (gt_tile + 1) * tile_p > P

        @pl.when(is_tail)
        def _masked():
            pix = gt_tile * tile_p + lax.broadcasted_iota(
                jnp.int32, loss.shape, 1)
            _accumulate(jnp.where(pix < P, loss, 0.0))   # select, not multiply

        @pl.when(jnp.logical_not(is_tail))
        def _plain():
            _accumulate(loss)
    else:
        _accumulate(loss)

    # Single cross-lane (XLU) reduce + lane-sparse store, once per sweep.
    @pl.when(k == pl.num_programs(2) - 1)
    def _finalize():
        out_ref[0] = jnp.sum(acc_ref[...], axis=-1, keepdims=True)


def _pick_tile_n(N):
    """Frame tile: sublane multiple when possible and small enough to leave
    >=2 blocks (prefer an even count) on the parallel frame axis, so v7x can
    use both TensorCores."""
    if N <= 8:
        return N                      # full-dim block is always BlockSpec-legal
    for want_even in (True, False):
        for c in (128, 64, 32, 16, 8):
            if N % c == 0:
                nb = N // c
                if nb >= 2 and (nb % 2 == 0 or not want_even):
                    return c
    # N > 8 but not a multiple of 8: use 8-row blocks with a partial last
    # frame block (OOB rows are read-garbage / write-dropped, never mixed into
    # valid rows) rather than degenerating to tile_n = N.
    return 8


def focal_loss_pallas(log_alpha_mask, segmentations, gamma=6,
                      tile_p=None, tile_n=None):
    """log_alpha_mask: (B, S, C, H, W, 1) log-probabilities (f32 or bf16)
       segmentations:  (B, S, H, W) integer class ids (int8/int16/int32/...)
       returns:        (B, S) float32, matching FocalLoss.forward
    """
    B, S, C, H, W, _ = log_alpha_mask.shape
    N, P = B * S, H * W

    # Keep gamma on the integer_pow path when possible.
    if isinstance(gamma, float) and float(gamma).is_integer():
        gamma = int(gamma)

    # Glue reshapes only (contiguous -> no copies) and NO dtype up-casts:
    # bf16 log-probs and narrow-int targets stream at native HBM width.
    logp = jnp.squeeze(log_alpha_mask, axis=5).reshape(N, C, P)
    if logp.dtype not in (jnp.dtype(jnp.float32), jnp.dtype(jnp.bfloat16)):
        logp = logp.astype(jnp.float32)
    tgt = segmentations.reshape(N, P)
    if tgt.dtype not in (jnp.dtype(jnp.int32), jnp.dtype(jnp.int16),
                         jnp.dtype(jnp.int8), jnp.dtype(jnp.uint8)):
        tgt = tgt.astype(jnp.int32)

    if tile_n is None:
        tile_n = _pick_tile_n(N)

    # ---- VMEM budgeting: clamp to ~48 MiB (safe on v7x's 64 MiB/core even if
    # the chip reports the 128 MiB total) and size tiles against real dtype
    # footprints with headroom for double buffering. ----
    vmem_limit = 48 * 1024 * 1024
    tile_budget = int(0.85 * vmem_limit)

    logp_item = jnp.dtype(logp.dtype).itemsize
    tgt_item = jnp.dtype(tgt.dtype).itemsize
    c_sub = 32 // logp_item                      # sublane tile of the class dim
    c_rows = -(-C // c_sub) * c_sub
    t_sub = 32 // tgt_item
    tn_rows_tgt = -(-tile_n // t_sub) * t_sub

    if tile_p is None:
        if P < 128:
            tile_p = P
        else:
            per_p = (2 * tile_n * c_rows * logp_item        # logp, double-buf
                     + 2 * tn_rows_tgt * tgt_item)          # tgt,  double-buf
            fixed = 3 * tile_n * 128 * 4 + (64 << 10)       # acc + out + misc
            max_tile_p = max(128,
                             ((tile_budget - fixed) // per_p) // 128 * 128)
            # 512-1024 lanes already sits at ~85-86% of the HBM roofline;
            # larger tiles buy ~nothing while eating VMEM.
            tile_p = min(max_tile_p, 2048, (P // 128) * 128)
    tile_p = min(tile_p, P)

    acc_lanes = min(tile_p, 128)
    assert tile_p % acc_lanes == 0, "tile_p must be a multiple of 128 (or == P)"

    n_frame_blocks = pl.cdiv(N, tile_n)
    total_tiles = pl.cdiv(P, tile_p)
    # Keep >=2 blocks on a parallel axis for v7x's two TensorCores: if the
    # frame axis collapsed to one block, split the pixel range in two parallel
    # halves writing separate output columns (summed in the wrapper epilogue).
    n_splits = 2 if (n_frame_blocks < 2 and total_tiles >= 2) else 1
    tiles_per_split = pl.cdiv(total_tiles, n_splits)
    mask_possible = (n_splits * tiles_per_split * tile_p) != P

    def _tile_idx(s, k):
        # Clamp: when total_tiles is odd the second split sees one duplicate
        # tile; its contribution is fully lane-masked to zero in the kernel.
        return jnp.minimum(s * tiles_per_split + k, total_tiles - 1)

    grid = (n_frame_blocks, n_splits, tiles_per_split)
    kernel = functools.partial(_focal_loss_kernel, gamma, C, P, tile_p,
                               tiles_per_split, acc_lanes, mask_possible)

    # TODO(synk): if profiling shows inter-step DMA gaps, sweep
    # pipeline_mode=pl.Buffered(3) on the logp BlockSpec (VMEM headroom exists).
    out = pl.pallas_call(
        kernel,
        out_shape=jax.ShapeDtypeStruct((n_splits, N, 1), jnp.float32),
        grid_spec=pltpu.PrefetchScalarGridSpec(
            num_scalar_prefetch=0,
            grid=grid,
            in_specs=[
                pl.BlockSpec((tile_n, C, tile_p),
                             lambda i, s, k: (i, 0, _tile_idx(s, k))),
                pl.BlockSpec((tile_n, tile_p),
                             lambda i, s, k: (i, _tile_idx(s, k))),
            ],
            out_specs=pl.BlockSpec((1, tile_n, 1), lambda i, s, k: (s, i, 0)),
            scratch_shapes=[pltpu.VMEM((tile_n, acc_lanes), jnp.float32)],
        ),
        compiler_params=pltpu.CompilerParams(
            dimension_semantics=("parallel", "parallel", "arbitrary"),
            vmem_limit_bytes=vmem_limit,
        ),
    )(logp, tgt)

    return out[:, :, 0].sum(axis=0).reshape(B, S)


def focal_loss_ref(log_alpha_mask, segmentations, gamma=6):
    """Pure-JAX reference mirroring the PyTorch forward exactly."""
    B, S, C, H, W, _ = log_alpha_mask.shape
    logp = jnp.squeeze(log_alpha_mask, axis=5).reshape(B * S, C, H * W)
    logp = logp.astype(jnp.float32)
    tgt = segmentations.reshape(B * S, H * W).astype(jnp.int32)
    logpt = jnp.take_along_axis(logp, tgt[:, None, :], axis=1)[:, 0, :]
    pt = jnp.exp(logpt)
    loss = -1.0 * (1.0 - pt) ** gamma * logpt
    return loss.reshape(B, S, -1).sum(-1)


if __name__ == "__main__":
    # Shapes consistent with the module's forward:
    #   log_alpha_mask (model_outputs[3]) : (B, S, C, H, W, 1)
    #   segmentations                     : (B, S, H, W)
    gamma = 6
    key = jax.random.PRNGKey(0)
    k1, k2, k3, k4, k5, k6 = jax.random.split(key, 6)

    def check(lam, seg, rtol=1e-5, atol=1e-5):
        out = jax.block_until_ready(focal_loss_pallas(lam, seg, gamma=gamma))
        ref = focal_loss_ref(lam, seg, gamma=gamma)
        assert out.shape == ref.shape
        if not jnp.allclose(out, ref, rtol=rtol, atol=atol):
            raise AssertionError(f"Pallas focal loss mismatch:\n{out}\nvs\n{ref}")

    # 1) f32 log-probs + int32 targets (module-default dtypes), single tile.
    B, S, C, H, W = 2, 4, 4, 16, 16
    raw = jax.random.normal(k1, (B, S, C, H, W, 1), dtype=jnp.float32)
    lam = jax.nn.log_softmax(raw, axis=2)
    seg = jax.random.randint(k2, (B, S, H, W), 0, C, dtype=jnp.int32)
    check(lam, seg)

    # 2) bf16 log-probs + int8 targets stream at native width (no wrapper casts).
    check(lam.astype(jnp.bfloat16), seg.astype(jnp.int8), rtol=1e-4, atol=1e-4)

    # 3) Small B*S + spatial size not a multiple of the lane tile:
    #    exercises the 2-way pixel-split parallel axis and the masked tail.
    H2, W2 = 12, 15
    raw2 = jax.random.normal(k3, (B, S, C, H2, W2, 1), dtype=jnp.float32)
    lam2 = jax.nn.log_softmax(raw2, axis=2)
    seg2 = jax.random.randint(k4, (B, S, H2, W2), 0, C, dtype=jnp.int32)
    check(lam2, seg2)

    # 4) Larger B*S, C>8 and multi-tile pixel reduction: exercises the chunked
    #    class gather, the multi-step accumulator and two parallel frame blocks.
    B3, S3, C3, H3, W3 = 2, 8, 11, 20, 22
    raw3 = jax.random.normal(k5, (B3, S3, C3, H3, W3, 1), dtype=jnp.float32)
    lam3 = jax.nn.log_softmax(raw3, axis=2)
    seg3 = jax.random.randint(k6, (B3, S3, H3, W3), 0, C3, dtype=jnp.int32)
    check(lam3, seg3)

    print("KERNEL_OK")
</pallas_src>

<mosaic_0001>
module attributes {stable_mosaic.version = 11 : i64} {
  func.func @_focal_loss_kernel(%arg0: i32, %arg1: i32, %arg2: i32, %arg3: memref<8x4x256xf32, #tpu.memory_space<vmem>>, %arg4: memref<8x256xi32, #tpu.memory_space<vmem>>, %arg5: memref<1x8x1xf32, #tpu.memory_space<vmem>>, %arg6: memref<8x128xf32, #tpu.memory_space<vmem>>) attributes {dimension_semantics = [#tpu.dimension_semantics<parallel>, #tpu.dimension_semantics<parallel>, #tpu.dimension_semantics<arbitrary>], iteration_bounds = array<i64: 1, 1, 1>, scalar_prefetch = 0 : i64, scratch_operands = 1 : i64, tpu.core_type = #tpu.core_type<tc>, window_params = [{transform_indices = @transform_0, window_bounds = array<i64: 8, 4, 256>}, {transform_indices = @transform_1, window_bounds = array<i64: 8, 256>}, {transform_indices = @transform_2, window_bounds = array<i64: 1, 8, 1>}]} {
    %c0_i32 = arith.constant 0 : i32
    %0 = arith.cmpi eq, %arg2, %c0_i32 : i32
    %1 = arith.extui %0 : i1 to i32
    %c0_i32_0 = arith.constant 0 : i32
    %2 = arith.cmpi ne, %1, %c0_i32_0 : i32
    scf.if %2 {
      %cst_16 = arith.constant 0.000000e+00 : f32
      %34 = vector.broadcast %cst_16 : f32 to vector<8x128xf32>
      %c0_17 = arith.constant 0 : index
      %c0_18 = arith.constant 0 : index
      %35 = vector.load %arg6[%c0_17, %c0_18] : memref<8x128xf32, #tpu.memory_space<vmem>>, vector<8x128xf32>
      tpu.vector_store %arg6[%c0_17, %c0_18], %34 {strides = array<i32>} : memref<8x128xf32, #tpu.memory_space<vmem>>, vector<8x128xf32>,
    } else {
    }
    %c0 = arith.constant 0 : index
    %c0_1 = arith.constant 0 : index
    %3 = vector.load %arg4[%c0, %c0_1] : memref<8x256xi32, #tpu.memory_space<vmem>>, vector<8x256xi32>
    %cst = arith.constant 0.000000e+00 : f32
    %4 = vector.broadcast %cst : f32 to vector<8x256xf32>
    %c0_2 = arith.constant 0 : index
    %c0_3 = arith.constant 0 : index
    %c0_4 = arith.constant 0 : index
    %5 = vector.load %arg3[%c0_2, %c0_3, %c0_4] : memref<8x4x256xf32, #tpu.memory_space<vmem>>, vector<8x4x256xf32>
    %6 = tpu.iota {dimensions = array<i32: 1>} : vector<8x4x256xi32>
    %c0_i32_5 = arith.constant 0 : i32
    %7 = vector.broadcast %c0_i32_5 : i32 to vector<8x4x256xi32>
    %8 = arith.addi %7, %6 : vector<8x4x256xi32>
    %9 = vector.shape_cast %3 : vector<8x256xi32> to vector<8x1x256xi32>
    %10 = vector.broadcast %9 : vector<8x1x256xi32> to vector<8x4x256xi32>
    %11 = arith.cmpi eq, %8, %10 : vector<8x4x256xi32>
    %cst_6 = arith.constant 0.000000e+00 : f32
    %12 = vector.broadcast %cst_6 : f32 to vector<8x4x256xf32>
    %13 = arith.select %11, %5, %12 : vector<8x4x256xi1>, vector<8x4x256xf32>
    %cst_7 = arith.constant dense<0.000000e+00> : vector<8x256xf32>
    %14 = vector.multi_reduction <add>, %13, %cst_7 [1] : vector<8x4x256xf32> to vector<8x256xf32>
    %15 = arith.addf %4, %14 : vector<8x256xf32>
    %16 = math.exp %15 : vector<8x256xf32>
    %cst_8 = arith.constant 1.000000e+00 : f32
    %17 = vector.broadcast %cst_8 : f32 to vector<8x256xf32>
    %18 = arith.subf %17, %16 : vector<8x256xf32>
    %19 = arith.mulf %18, %18 : vector<8x256xf32>
    %20 = arith.mulf %19, %19 : vector<8x256xf32>
    %21 = arith.mulf %19, %20 : vector<8x256xf32>
    %cst_9 = arith.constant -1.000000e+00 : f32
    %22 = vector.broadcast %cst_9 : f32 to vector<8x256xf32>
    %23 = arith.mulf %22, %21 : vector<8x256xf32>
    %24 = arith.mulf %23, %15 : vector<8x256xf32>
    %25 = vector.extract_strided_slice %24 {offsets = [0, 0], sizes = [8, 128], strides = [1, 1]} : vector<8x256xf32> to vector<8x128xf32>
    %26 = vector.extract_strided_slice %24 {offsets = [0, 128], sizes = [8, 128], strides = [1, 1]} : vector<8x256xf32> to vector<8x128xf32>
    %27 = arith.addf %25, %26 : vector<8x128xf32>
    %c0_10 = arith.constant 0 : index
    %c0_11 = arith.constant 0 : index
    %28 = vector.load %arg6[%c0_10, %c0_11] : memref<8x128xf32, #tpu.memory_space<vmem>>, vector<8x128xf32>
    %29 = arith.addf %28, %27 : vector<8x128xf32>
    %c0_12 = arith.constant 0 : index
    %c0_13 = arith.constant 0 : index
    %30 = vector.load %arg6[%c0_12, %c0_13] : memref<8x128xf32, #tpu.memory_space<vmem>>, vector<8x128xf32>
    tpu.vector_store %arg6[%c0_12, %c0_13], %29 {strides = array<i32>} : memref<8x128xf32, #tpu.memory_space<vmem>>, vector<8x128xf32>,
    %c0_i32_14 = arith.constant 0 : i32
    %31 = arith.cmpi eq, %arg2, %c0_i32_14 : i32
    %32 = arith.extui %31 : i1 to i32
    %c0_i32_15 = arith.constant 0 : i32
    %33 = arith.cmpi ne, %32, %c0_i32_15 : i32
    scf.if %33 {
      %c0_16 = arith.constant 0 : index
      %c0_17 = arith.constant 0 : index
      %34 = vector.load %arg6[%c0_16, %c0_17] : memref<8x128xf32, #tpu.memory_space<vmem>>, vector<8x128xf32>
      %cst_18 = arith.constant dense<0.000000e+00> : vector<8xf32>
      %35 = vector.multi_reduction <add>, %34, %cst_18 [1] : vector<8x128xf32> to vector<8xf32>
      %36 = vector.shape_cast %35 : vector<8xf32> to vector<8x1xf32>
      %c0_19 = arith.constant 0 : index
      %c0_20 = arith.constant 0 : index
      %c0_21 = arith.constant 0 : index
      %37 = vector.load %arg5[%c0_19, %c0_20, %c0_21] : memref<1x8x1xf32, #tpu.memory_space<vmem>>, vector<1x8x1xf32>
      %38 = vector.shape_cast %37 : vector<1x8x1xf32> to vector<8x1xf32>
      %39 = vector.shape_cast %36 : vector<8x1xf32> to vector<1x8x1xf32>
      tpu.vector_store %arg5[%c0_19, %c0_20, %c0_21], %39 {strides = array<i32>} : memref<1x8x1xf32, #tpu.memory_space<vmem>>, vector<1x8x1xf32>,
    } else {
    }
    return
  }
  func.func @transform_0(%arg0: i32, %arg1: i32, %arg2: i32) -> (i32, i32, i32) {
    %c1_i32 = arith.constant 1 : i32
    %0 = arith.muli %arg1, %c1_i32 : i32
    %1 = arith.addi %0, %arg2 : i32
    %c0_i32 = arith.constant 0 : i32
    %2 = arith.minsi %1, %c0_i32 : i32
    %c0_i32_0 = arith.constant 0 : i32
    %c0_i32_1 = arith.constant 0 : i32
    return %arg0, %c0_i32_0, %2 : i32, i32, i32
  }
  func.func @transform_1(%arg0: i32, %arg1: i32, %arg2: i32) -> (i32, i32) {
    %c1_i32 = arith.constant 1 : i32
    %0 = arith.muli %arg1, %c1_i32 : i32
    %1 = arith.addi %0, %arg2 : i32
    %c0_i32 = arith.constant 0 : i32
    %2 = arith.minsi %1, %c0_i32 : i32
    %c0_i32_0 = arith.constant 0 : i32
    return %arg0, %2 : i32, i32
  }
  func.func @transform_2(%arg0: i32, %arg1: i32, %arg2: i32) -> (i32, i32, i32) {
    %c0_i32 = arith.constant 0 : i32
    %c0_i32_0 = arith.constant 0 : i32
    return %arg1, %arg0, %c0_i32 : i32, i32, i32
  }
}

</mosaic_0001>

<bundles_post_ra>
// kernel: tpu_custom_call.1
= control target key start
LH: loop header
LB: loop body
LE: loop exit
PB: predicated region body
PF: predicated region fallthrough
CT: control target
= control target key end

     0   :  { %7 = vsyncpa [#allocation4], 0  ;;  %s764_s0 = inlined_call_operand.hbm [shape: f32[8,4,256], index: 0, kind: input, shape index: {}]   ;;  %s765_s1 = inlined_call_operand.hbm [shape: s32[8,256], index: 1, kind: input, shape index: {}]   ;;  %s766_s2 = inlined_call_operand.vmem [shape: f32[1,8,1], index: 2, kind: output, shape index: {}]  }
   0x1   :  { %s19_s11 = sshll.u32 %s764_s0, 4  ;;  %s20_s11 = int_to_ptr.hbm [resolvable:$true] %s19_s11 }
   0x2   :  { %8 = vsyncpa [#allocation6], 0  ;;  %s592_s12 = smov [#allocation3]   ;;  %s39_s16 = sshll.u32 %s765_s1, 4  ;;  %s40_s16 = int_to_ptr.hbm [resolvable:$true] %s39_s16 }
   0x3   :  { %s21_s13 = sshll.u32 %s592_s12, 4  ;;  %s593_s17 = smov 128   ;;  %s22_s13 = int_to_ptr.vmem [resolvable:$true] %s21_s13 }
   0x4   :  { %s594_s18 = smov 8   ;;  %s595_s19 = smov [#allocation5]  }
   0x5   :  { %27 = dma.hbm_to_vmem [thread:$0]  %s20_s11, 1024, %s22_s13, [#allocation4], %s593_s17, %s593_s17, %s594_s18  }
   0x6   :  { %s41_s20 = sshll.u32 %s595_s19, 4  ;;  %s42_s20 = int_to_ptr.vmem [resolvable:$true] %s41_s20 }
   0x7   :  { %44 = dma.hbm_to_vmem [thread:$0]  %s40_s16, 256, %s42_s20, [#allocation6]  }
   0x8   :  { %588 = dma.done.wait [#allocation4], 1024  }
   0x9   :  { %589 = vsyncadd [#allocation4], 4294966272 }
   0xa   :  { %590 = dma.done.wait [#allocation6], 256  }
   0xb   :  { %591 = vsyncadd [#allocation6], 4294967040  ;;  %vm79_vm0 = vcmask 1040384   ;;  %v66_v0 = vld [vmem:[#allocation5] sm:$0xff]  ;;  %v67_v1 = vld [vmem:[#allocation5 + $0x8] sm:$0xff]  ;;  %vm81_vm1 = vcmask 1041409   ;;  %v76_v7 = vlaneseq }
   0xc   :  { %v68_v2 = vld [vmem:[#allocation3] sm:$0xff]  ;;  %vm84_vm2 = vcmask 1042434   ;;  %vm87_vm3 = vcmask 1043459   ;;  %v69_v3 = vld [vmem:[#allocation3 + $0x8] sm:$0xff]  ;;  %v70_v4 = vld [vmem:[#allocation3 + $0x10] sm:$0xff]  ;;  %v78_v6 = vrot.slane %v67_v1, 7 }
   0xd   :  { %v71_v5 = vld [vmem:[#allocation3 + $0x18] sm:$0xff]  ;;  %142 = vst [vmem:[#allocation1] ss:$2 sm:$0xff] %v68_v2  ;;  %vm90_vm4 = vcmask 1044484   ;;  %vm93_vm5 = vcmask 1045509   ;;  %vm96_vm6 = vcmask 1046534  }
   0xe   :  { %146 = vst [vmem:[#allocation1 + $0x10] ss:$2 sm:$0xff] %v69_v3  ;;  %v82_v8 = vsel %vm81_vm1, %v66_v0, %v78_v6  ;;  %v85_v9 = vsel %vm84_vm2, %v66_v0, %v78_v6  ;;  %v88_v10 = vsel %vm87_vm3, %v66_v0, %v78_v6  ;;  %v80_v11 = vsel %vm79_vm0, %v66_v0, %v78_v6  ;;  %v72_v24 = vld [vmem:[#allocation3 + $0x20] sm:$0xff]  ;;  %v73_v27 = vld [vmem:[#allocation3 + $0x28] sm:$0xff]  ;;  %v74_v32 = vld [vmem:[#allocation3 + $0x30] sm:$0xff] }
   0xf   :  { %150 = vst [vmem:[#allocation1 + $0x20] ss:$2 sm:$0xff] %v70_v4  ;;  %v83_v12 = vrot.slane %v82_v8, 1  ;;  %v86_v13 = vrot.slane %v85_v9, 2  ;;  %v89_v14 = vrot.slane %v88_v10, 3  ;;  %v91_v15 = vsel %vm90_vm4, %v66_v0, %v78_v6  ;;  %v75_v36 = vld [vmem:[#allocation3 + $0x38] sm:$0xff] }
  0x10   :  { %154 = vst [vmem:[#allocation1 + $0x30] ss:$2 sm:$0xff] %v71_v5  ;;  %v622_v16 = vshrl.u32 %v76_v7, 7  ;;  %v94_v17 = vsel %vm93_vm5, %v66_v0, %v78_v6  ;;  %v97_v18 = vsel %vm96_vm6, %v66_v0, %v78_v6  ;;  %v102_v19 = vperm.slane %v80_v11, 0 }
  0x11   :  { %v103_v20 = vperm.slane %v80_v11, 1  ;;  %v104_v21 = vperm.slane %v83_v12, 0  ;;  %v105_v22 = vperm.slane %v83_v12, 1  ;;  %v106_v23 = vperm.slane %v86_v13, 0 }
  0x12   :  { %v92_v25 = vrot.slane %v91_v15, 4  ;;  %vm99_vm7 = vcmask 1046528   ;;  %v107_v26 = vperm.slane %v86_v13, 1  ;;  %vm201_vm8 = vcmask 1043456  }
  0x13   :  { %v95_v28 = vrot.slane %v94_v17, 5  ;;  %v98_v29 = vrot.slane %v97_v18, 6  ;;  %v108_v30 = vperm.slane %v89_v14, 0  ;;  %vm627_vm9 = vcmp.eq.s32.totalorder %v622_v16, %v102_v19 }
  0x14   :  { %v143_v31 = vld.sshfl [vmem:[#allocation1] sm:$0xff pattern:$0x75316420]  ;;  %v144_v34 = vld.sshfl [vmem:[#allocation1 + $0x8] sm:$0xff pattern:$0x75316420]  ;;  %vm632_vm10 = vcmp.eq.s32.totalorder %v622_v16, %v103_v20  ;;  %vm120_vm11 = vcmp.eq.s32.totalorder %v622_v16, %v104_v21  ;;  %vm121_vm12 = vcmp.eq.s32.totalorder %v622_v16, %v105_v22  ;;  %vm122_vm13 = vcmp.eq.s32.totalorder %v622_v16, %v106_v23 }
  0x15   :  { %v147_v35 = vld.sshfl [vmem:[#allocation1 + $0x10] sm:$0xff pattern:$0x75316420]  ;;  %v148_v38 = vld.sshfl [vmem:[#allocation1 + $0x18] sm:$0xff pattern:$0x75316420]  ;;  %v100_v40 = vsel %vm99_vm7, %v78_v6, %v66_v0  ;;  %vm123_vm14 = vcmp.eq.s32.totalorder %v622_v16, %v107_v26  ;;  %vm124_vm15 = vcmp.eq.s32.totalorder %v622_v16, %v108_v30 }
  0x16   :  { %v151_v39 = vld.sshfl [vmem:[#allocation1 + $0x20] sm:$0xff pattern:$0x75316420]  ;;  %v152_v41 = vld.sshfl [vmem:[#allocation1 + $0x28] sm:$0xff pattern:$0x75316420] }
  0x17   :  { %v155_v42 = vld.sshfl [vmem:[#allocation1 + $0x30] sm:$0xff pattern:$0x75316420]  ;;  %v156_v43 = vld.sshfl [vmem:[#allocation1 + $0x38] sm:$0xff pattern:$0x75316420] }
  0x18   :  { %157 = vst [vmem:[#allocation1] ss:$2 sm:$0xff] %v72_v24  ;;  %v185_v44 = vsel %vm627_vm9, %v143_v31, 0.0  ;;  %v186_v45 = vsel %vm632_vm10, %v144_v34, 0.0  ;;  %v187_v46 = vsel %vm120_vm11, %v147_v35, 0.0  ;;  %v188_v47 = vsel %vm121_vm12, %v148_v38, 0.0 }
  0x19   :  { %160 = vst [vmem:[#allocation1 + $0x10] ss:$2 sm:$0xff] %v73_v27  ;;  %v189_v48 = vsel %vm122_vm13, %v151_v39, 0.0  ;;  %v101_v49 = vrot.slane %v100_v40, 7  ;;  %v109_v50 = vperm.slane %v89_v14, 1  ;;  %v190_v51 = vsel %vm123_vm14, %v152_v41, 0.0 }
  0x1a   :  { %163 = vst [vmem:[#allocation1 + $0x20] ss:$2 sm:$0xff] %v74_v32  ;;  %v202_v52 = vsel %vm201_vm8, %v185_v44, 0.0  ;;  %v110_v53 = vperm.slane %v92_v25, 0  ;;  %v209_v54 = vsel %vm201_vm8, %v186_v45, 0.0  ;;  %v216_v55 = vsel %vm201_vm8, %v187_v46, 0.0 }
  0x1b   :  { %166 = vst [vmem:[#allocation1 + $0x30] ss:$2 sm:$0xff] %v75_v36  ;;  %v223_v56 = vsel %vm201_vm8, %v188_v47, 0.0  ;;  %v111_v57 = vperm.slane %v92_v25, 1  ;;  %v203_v58 = vrot.slane %v202_v52, 4  ;;  %v230_v59 = vsel %vm201_vm8, %v189_v48, 0.0 }
  0x1c   :  { %v210_v60 = vrot.slane %v209_v54, 4  ;;  %v217_v61 = vrot.slane %v216_v55, 4  ;;  %v224_v62 = vrot.slane %v223_v56, 4  ;;  %v237_v63 = vsel %vm201_vm8, %v190_v51, 0.0 }
  0x1d   :  { %v112_v0 = vperm.slane %v95_v28, 0  ;;  %v113_v1 = vperm.slane %v95_v28, 1  ;;  %v231_v2 = vrot.slane %v230_v59, 4  ;;  %v238_v3 = vrot.slane %v237_v63, 4 }
  0x1e   :  { %v114_v4 = vperm.slane %v98_v29, 0  ;;  %v115_v5 = vperm.slane %v98_v29, 1  ;;  %v116_v6 = vperm.slane %v101_v49, 0  ;;  %v117_v7 = vperm.slane %v101_v49, 1 }
  0x1f   :  { %vm125_vm0 = vcmp.eq.s32.totalorder %v622_v16, %v109_v50  ;;  %vm126_vm7 = vcmp.eq.s32.totalorder %v622_v16, %v110_v53  ;;  %vm127_vm9 = vcmp.eq.s32.totalorder %v622_v16, %v111_v57  ;;  %v191_v8 = vsel %vm124_vm15, %v155_v42, 0.0  ;;  %v158_v9 = vld.sshfl [vmem:[#allocation1] sm:$0xff pattern:$0x75316420] }
  0x20   :  { %v159_v10 = vld.sshfl [vmem:[#allocation1 + $0x8] sm:$0xff pattern:$0x75316420]  ;;  %v204_v11 = vadd.f32 %v203_v58, %v202_v52  ;;  %v211_v12 = vadd.f32 %v210_v60, %v209_v54  ;;  %v218_v13 = vadd.f32 %v217_v61, %v216_v55  ;;  %v225_v14 = vadd.f32 %v224_v62, %v223_v56  ;;  %v161_v20 = vld.sshfl [vmem:[#allocation1 + $0x10] sm:$0xff pattern:$0x75316420] }
  0x21   :  { %vm128_vm10 = vcmp.eq.s32.totalorder %v622_v16, %v112_v0  ;;  %vm129_vm11 = vcmp.eq.s32.totalorder %v622_v16, %v113_v1  ;;  %v232_v15 = vadd.f32 %v231_v2, %v230_v59  ;;  %v239_v17 = vadd.f32 %v238_v3, %v237_v63  ;;  %v162_v21 = vld.sshfl [vmem:[#allocation1 + $0x18] sm:$0xff pattern:$0x75316420]  ;;  %v164_v22 = vld.sshfl [vmem:[#allocation1 + $0x20] sm:$0xff pattern:$0x75316420] }
  0x22   :  { %vm130_vm12 = vcmp.eq.s32.totalorder %v622_v16, %v114_v4  ;;  %vm131_vm13 = vcmp.eq.s32.totalorder %v622_v16, %v115_v5  ;;  %v192_v18 = vsel %vm125_vm0, %v156_v43, 0.0  ;;  %v244_v19 = vsel %vm201_vm8, %v191_v8, 0.0  ;;  %v165_v23 = vld.sshfl [vmem:[#allocation1 + $0x28] sm:$0xff pattern:$0x75316420] }
  0x23   :  { %vm132_vm14 = vcmp.eq.s32.totalorder %v622_v16, %v116_v6  ;;  %vm133_vm15 = vcmp.eq.s32.totalorder %v622_v16, %v117_v7  ;;  %v193_v24 = vsel %vm126_vm7, %v158_v9, 0.0  ;;  %v194_v25 = vsel %vm127_vm9, %v159_v10, 0.0  ;;  %v167_v34 = vld.sshfl [vmem:[#allocation1 + $0x30] sm:$0xff pattern:$0x75316420] }
  0x24   :  { %v205_v26 = vrot.slane %v204_v11, 2  ;;  %v212_v27 = vrot.slane %v211_v12, 2  ;;  %v219_v28 = vrot.slane %v218_v13, 2  ;;  %v226_v29 = vrot.slane %v225_v14, 2 }
  0x25   :  { %v233_v30 = vrot.slane %v232_v15, 2  ;;  %v240_v31 = vrot.slane %v239_v17, 2  ;;  %v245_v32 = vrot.slane %v244_v19, 4  ;;  %v251_v33 = vsel %vm201_vm8, %v192_v18, 0.0 }
  0x26   :  { %v206_v35 = vadd.f32 %v205_v26, %v204_v11  ;;  %v213_v36 = vadd.f32 %v212_v27, %v211_v12  ;;  %v220_v37 = vadd.f32 %v219_v28, %v218_v13  ;;  %v227_v38 = vadd.f32 %v226_v29, %v225_v14  ;;  %v168_v39 = vld.sshfl [vmem:[#allocation1 + $0x38] sm:$0xff pattern:$0x75316420] }
  0x27   :  { %v234_v40 = vadd.f32 %v233_v30, %v232_v15  ;;  %v241_v41 = vadd.f32 %v240_v31, %v239_v17  ;;  %v246_v42 = vadd.f32 %v245_v32, %v244_v19  ;;  %v252_v43 = vrot.slane %v251_v33, 4 }
  0x28   :  { %v195_v44 = vsel %vm128_vm10, %v161_v20, 0.0  ;;  %v196_v45 = vsel %vm129_vm11, %v162_v21, 0.0  ;;  %v197_v46 = vsel %vm130_vm12, %v164_v22, 0.0  ;;  %v198_v47 = vsel %vm131_vm13, %v165_v23, 0.0 }
  0x29   :  { %v199_v48 = vsel %vm132_vm14, %v167_v34, 0.0  ;;  %v207_v49 = vrot.slane %v206_v35, 1  ;;  %v247_v50 = vrot.slane %v246_v42, 2  ;;  %v253_v51 = vadd.f32 %v252_v43, %v251_v33 }
  0x2a   :  { %v200_v52 = vsel %vm133_vm15, %v168_v39, 0.0  ;;  %v214_v53 = vrot.slane %v213_v36, 1  ;;  %v221_v54 = vrot.slane %v220_v37, 1  ;;  %v228_v55 = vrot.slane %v227_v38, 1 }
  0x2b   :  { %v235_v56 = vrot.slane %v234_v40, 1  ;;  %v242_v57 = vrot.slane %v241_v41, 1  ;;  %v248_v58 = vadd.f32 %v247_v50, %v246_v42  ;;  %v254_v59 = vrot.slane %v253_v51, 2 }
  0x2c   :  { %v258_v60 = vsel %vm201_vm8, %v193_v24, 0.0  ;;  %v265_v61 = vsel %vm201_vm8, %v194_v25, 0.0  ;;  %v272_v62 = vsel %vm201_vm8, %v195_v44, 0.0  ;;  %v279_v63 = vsel %vm201_vm8, %v196_v45, 0.0 }
  0x2d   :  { %v687_v0 = vadd.f32 %v207_v49, %v206_v35  ;;  %v255_v1 = vadd.f32 %v254_v59, %v253_v51  ;;  %v259_v16 = vrot.slane %v258_v60, 4  ;;  %v266_v2 = vrot.slane %v265_v61, 4 }
  0x2e   :  { %v273_v3 = vrot.slane %v272_v62, 4  ;;  %v280_v4 = vrot.slane %v279_v63, 4  ;;  %v286_v5 = vsel %vm201_vm8, %v197_v46, 0.0  ;;  %v293_v6 = vsel %vm201_vm8, %v198_v47, 0.0 }
  0x2f   :  { %v691_v7 = vadd.f32 %v214_v53, %v213_v36  ;;  %v249_v8 = vrot.slane %v248_v58, 1  ;;  %v260_v9 = vadd.f32 %v259_v16, %v258_v60  ;;  %v267_v10 = vadd.f32 %v266_v2, %v265_v61 }
  0x30   :  { %v274_v11 = vadd.f32 %v273_v3, %v272_v62  ;;  %v281_v12 = vadd.f32 %v280_v4, %v279_v63  ;;  %v287_v13 = vrot.slane %v286_v5, 4  ;;  %v294_v14 = vrot.slane %v293_v6, 4 }
  0x31   :  { %v256_v15 = vrot.slane %v255_v1, 1  ;;  %v261_v17 = vrot.slane %v260_v9, 2  ;;  %v268_v18 = vrot.slane %v267_v10, 2  ;;  %v300_v19 = vsel %vm201_vm8, %v199_v48, 0.0 }
  0x32   :  { %v275_v20 = vrot.slane %v274_v11, 2  ;;  %v282_v21 = vrot.slane %v281_v12, 2  ;;  %v288_v22 = vadd.f32 %v287_v13, %v286_v5  ;;  %v295_v23 = vadd.f32 %v294_v14, %v293_v6 }
  0x33   :  { %v262_v24 = vadd.f32 %v261_v17, %v260_v9  ;;  %v269_v25 = vadd.f32 %v268_v18, %v267_v10  ;;  %v301_v26 = vrot.slane %v300_v19, 4  ;;  %v307_v27 = vsel %vm201_vm8, %v200_v52, 0.0 }
  0x34   :  { %v276_v28 = vadd.f32 %v275_v20, %v274_v11  ;;  %v283_v29 = vadd.f32 %v282_v21, %v281_v12  ;;  %v289_v30 = vrot.slane %v288_v22, 2  ;;  %v296_v31 = vrot.slane %v295_v23, 2 }
  0x35   :  { %v695_v32 = vadd.f32 %v221_v54, %v220_v37  ;;  %v697_v33 = vadd.f32 %v228_v55, %v227_v38  ;;  %v302_v34 = vadd.f32 %v301_v26, %v300_v19  ;;  %v308_v35 = vrot.slane %v307_v27, 4 }
  0x36   :  { %v699_v36 = vadd.f32 %v235_v56, %v234_v40  ;;  %v701_v39 = vadd.f32 %v242_v57, %v241_v41  ;;  %v263_v42 = vrot.slane %v262_v24, 1  ;;  %v290_v43 = vadd.f32 %v289_v30, %v288_v22 }
  0x37   :  { %v703_v44 = vadd.f32 %v249_v8, %v248_v58  ;;  %v297_v45 = vadd.f32 %v296_v31, %v295_v23  ;;  %v303_v46 = vrot.slane %v302_v34, 2  ;;  %v309_v47 = vadd.f32 %v308_v35, %v307_v27 }
  0x38   :  { %v705_v48 = vadd.f32 %v256_v15, %v255_v1  ;;  %v270_v49 = vrot.slane %v269_v25, 1  ;;  %v277_v37 = vrot.slane %v276_v28, 1  ;;  %v284_v50 = vrot.slane %v283_v29, 1 }
  0x39   :  { %v304_v38 = vadd.f32 %v303_v46, %v302_v34  ;;  %v310_v51 = vrot.slane %v309_v47, 2  ;;  %v330_v52 = vmul.f32 1.442695, %v687_v0  ;;  %v332_v40 = vmul.f32 1.442695, %v691_v7 }
  0x3a   :  { %v709_v41 = vadd.f32 %v263_v42, %v262_v24  ;;  %v291_v53 = vrot.slane %v290_v43, 1  ;;  %v334_v54 = vmul.f32 1.442695, %v695_v32  ;;  %v336_v55 = vmul.f32 1.442695, %v697_v33 }
  0x3b   :  { %v298_v56 = vrot.slane %v297_v45, 1  ;;  %v311_v57 = vadd.f32 %v310_v51, %v309_v47  ;;  %508 = vpow2.f32 %v330_v52  ;;  %v338_v58 = vmul.f32 1.442695, %v699_v36 }
  0x3c   :  { %v714_v59 = vadd.f32 %v270_v49, %v269_v25  ;;  %v305_v60 = vrot.slane %v304_v38, 1  ;;  %510 = vpow2.f32 %v332_v40  ;;  %v340_v61 = vmul.f32 1.442695, %v701_v39 }
  0x3d   :  { %v717_v62 = vadd.f32 %v277_v37, %v276_v28  ;;  %v312_v63 = vrot.slane %v311_v57, 1  ;;  %512 = vpow2.f32 %v334_v54  ;;  %v342_v1 = vmul.f32 1.442695, %v703_v44 }
  0x3e   :  { %v720_v16 = vadd.f32 %v284_v50, %v283_v29  ;;  %514 = vpow2.f32 %v336_v55  ;;  %v344_v2 = vmul.f32 1.442695, %v705_v48  ;;  %v723_v3 = vadd.f32 %v291_v53, %v290_v43 }
  0x3f   :  { %v725_v4 = vadd.f32 %v298_v56, %v297_v45  ;;  %516 = vpow2.f32 %v338_v58  ;;  %v346_v5 = vmul.f32 1.442695, %v709_v41  ;;  %v728_v6 = vadd.f32 %v305_v60, %v304_v38 }
  0x40   :  { %518 = vpow2.f32 %v340_v61  ;;  %v348_v8 = vmul.f32 1.442695, %v714_v59  ;;  %v731_v10 = vadd.f32 %v312_v63, %v311_v57  ;;  %v350_v11 = vmul.f32 1.442695, %v717_v62 }
  0x41   :  { %v509_v9 = vpop.eup %508  ;;  %520 = vpow2.f32 %v342_v1  ;;  %v352_v13 = vmul.f32 1.442695, %v720_v16  ;;  %v354_v17 = vmul.f32 1.442695, %v723_v3  ;;  %v356_v18 = vmul.f32 1.442695, %v725_v4 }
  0x42   :  { %v511_v12 = vpop.eup %510  ;;  %522 = vpow2.f32 %v344_v2  ;;  %v362_v14 = vsub.f32 1.0, %v509_v9  ;;  %v358_v21 = vmul.f32 1.442695, %v728_v6  ;;  %v360_v25 = vmul.f32 1.442695, %v731_v10 }
  0x43   :  { %v513_v15 = vpop.eup %512  ;;  %524 = vpow2.f32 %v346_v5  ;;  %v363_v19 = vsub.f32 1.0, %v511_v12  ;;  %vm481_vm8 = vcmask 1047559   ;;  %vm492_vm0 = vcmask 7168  }
  0x44   :  { %v515_v20 = vpop.eup %514  ;;  %526 = vpow2.f32 %v348_v8  ;;  %v364_v22 = vsub.f32 1.0, %v513_v15  ;;  %v378_v23 = vmul.f32 %v362_v14, %v362_v14 }
  0x45   :  { %v517_v24 = vpop.eup %516  ;;  %528 = vpow2.f32 %v350_v11  ;;  %v365_v26 = vsub.f32 1.0, %v515_v20  ;;  %v379_v27 = vmul.f32 %v363_v19, %v363_v19 }
  0x46   :  { %v519_v28 = vpop.eup %518  ;;  %530 = vpow2.f32 %v352_v13  ;;  %v366_v29 = vsub.f32 1.0, %v517_v24  ;;  %v380_v30 = vmul.f32 %v364_v22, %v364_v22  ;;  %v394_v31 = vmul.f32 %v378_v23, %v378_v23 }
  0x47   :  { %v521_v34 = vpop.eup %520  ;;  %532 = vpow2.f32 %v354_v17  ;;  %v367_v35 = vsub.f32 1.0, %v519_v28  ;;  %v381_v42 = vmul.f32 %v365_v26, %v365_v26  ;;  %v395_v43 = vmul.f32 %v379_v27, %v379_v27 }
  0x48   :  { %v523_v45 = vpop.eup %522  ;;  %534 = vpow2.f32 %v356_v18  ;;  %v368_v46 = vsub.f32 1.0, %v521_v34  ;;  %v382_v47 = vmul.f32 %v366_v29, %v366_v29  ;;  %v396_v49 = vmul.f32 %v380_v30, %v380_v30 }
  0x49   :  { %v525_v37 = vpop.eup %524  ;;  %536 = vpow2.f32 %v358_v21  ;;  %v369_v50 = vsub.f32 1.0, %v523_v45  ;;  %v383_v38 = vmul.f32 %v367_v35, %v367_v35  ;;  %v397_v51 = vmul.f32 %v381_v42, %v381_v42 }
  0x4a   :  { %v527_v52 = vpop.eup %526  ;;  %538 = vpow2.f32 %v360_v25  ;;  %v370_v40 = vsub.f32 1.0, %v525_v37  ;;  %v384_v53 = vmul.f32 %v368_v46, %v368_v46  ;;  %v398_v54 = vmul.f32 %v382_v47, %v382_v47 }
  0x4b   :  { %v529_v55 = vpop.eup %528  ;;  %v371_v56 = vsub.f32 1.0, %v527_v52  ;;  %v385_v57 = vmul.f32 %v369_v50, %v369_v50  ;;  %v399_v58 = vmul.f32 %v383_v38, %v383_v38  ;;  %v410_v60 = vmul.f32 %v394_v31, %v378_v23 }
  0x4c   :  { %v531_v61 = vpop.eup %530  ;;  %v372_v63 = vsub.f32 1.0, %v529_v55  ;;  %v386_v1 = vmul.f32 %v370_v40, %v370_v40  ;;  %v400_v2 = vmul.f32 %v384_v53, %v384_v53  ;;  %v411_v5 = vmul.f32 %v395_v43, %v379_v27 }
  0x4d   :  { %v533_v8 = vpop.eup %532  ;;  %v373_v9 = vsub.f32 1.0, %v531_v61  ;;  %v387_v11 = vmul.f32 %v371_v56, %v371_v56  ;;  %v401_v12 = vmul.f32 %v385_v57, %v385_v57  ;;  %v412_v13 = vmul.f32 %v396_v49, %v380_v30 }
  0x4e   :  { %v535_v14 = vpop.eup %534  ;;  %v374_v15 = vsub.f32 1.0, %v533_v8  ;;  %v388_v17 = vmul.f32 %v372_v63, %v372_v63  ;;  %v402_v18 = vmul.f32 %v386_v1, %v386_v1  ;;  %v413_v19 = vmul.f32 %v397_v51, %v381_v42 }
  0x4f   :  { %v537_v20 = vpop.eup %536  ;;  %v375_v21 = vsub.f32 1.0, %v535_v14  ;;  %v389_v22 = vmul.f32 %v373_v9, %v373_v9  ;;  %v403_v24 = vmul.f32 %v387_v11, %v387_v11  ;;  %v414_v23 = vmul.f32 %v398_v54, %v382_v47 }
  0x50   :  { %v539_v25 = vpop.eup %538  ;;  %v376_v26 = vsub.f32 1.0, %v537_v20  ;;  %v390_v28 = vmul.f32 %v374_v15, %v374_v15  ;;  %v404_v29 = vmul.f32 %v388_v17, %v388_v17  ;;  %v415_v27 = vmul.f32 %v399_v58, %v383_v38 }
  0x51   :  { %v377_v31 = vsub.f32 1.0, %v539_v25  ;;  %v391_v34 = vmul.f32 %v375_v21, %v375_v21  ;;  %v405_v35 = vmul.f32 %v389_v22, %v389_v22  ;;  %v416_v43 = vmul.f32 %v400_v2, %v384_v53 }
  0x52   :  { %v392_v30 = vmul.f32 %v376_v26, %v376_v26  ;;  %v406_v45 = vmul.f32 %v390_v28, %v390_v28  ;;  %v417_v46 = vmul.f32 %v401_v12, %v385_v57  ;;  %v418_v49 = vmul.f32 %v402_v18, %v386_v1 }
  0x53   :  { %v393_v37 = vmul.f32 %v377_v31, %v377_v31  ;;  %v407_v42 = vmul.f32 %v391_v34, %v391_v34  ;;  %v419_v50 = vmul.f32 %v403_v24, %v387_v11  ;;  %v420_v51 = vmul.f32 %v404_v29, %v388_v17 }
  0x54   :  { %v408_v52 = vmul.f32 %v392_v30, %v392_v30  ;;  %v421_v40 = vmul.f32 %v405_v35, %v389_v22  ;;  %v422_v47 = vmul.f32 %v406_v45, %v390_v28  ;;  %v426_v54 = vmul.f32 -1.0, %v410_v60 }
  0x55   :  { %v409_v55 = vmul.f32 %v393_v37, %v393_v37  ;;  %v423_v56 = vmul.f32 %v407_v42, %v391_v34  ;;  %v427_v61 = vmul.f32 -1.0, %v411_v5  ;;  %v428_v38 = vmul.f32 -1.0, %v412_v13 }
  0x56   :  { %v424_v58 = vmul.f32 %v408_v52, %v392_v30  ;;  %v429_v63 = vmul.f32 -1.0, %v413_v19  ;;  %v430_v8 = vmul.f32 -1.0, %v414_v23  ;;  %v431_v53 = vmul.f32 -1.0, %v415_v27 }
  0x57   :  { %v425_v2 = vmul.f32 %v409_v55, %v393_v37  ;;  %v432_v9 = vmul.f32 -1.0, %v416_v43  ;;  %v433_v57 = vmul.f32 -1.0, %v417_v46  ;;  %v434_v1 = vmul.f32 -1.0, %v418_v49 }
  0x58   :  { %v435_v12 = vmul.f32 -1.0, %v419_v50  ;;  %v436_v14 = vmul.f32 -1.0, %v420_v51  ;;  %v437_v11 = vmul.f32 -1.0, %v421_v40  ;;  %v438_v15 = vmul.f32 -1.0, %v422_v47 }
  0x59   :  { %v439_v17 = vmul.f32 -1.0, %v423_v56  ;;  %v440_v18 = vmul.f32 -1.0, %v424_v58  ;;  %v441_v20 = vmul.f32 -1.0, %v425_v2  ;;  %v442_v60 = vmul.f32 %v426_v54, %v687_v0 }
  0x5a   :  { %v443_v5 = vmul.f32 %v427_v61, %v691_v7  ;;  %v444_v13 = vmul.f32 %v428_v38, %v695_v32  ;;  %v445_v19 = vmul.f32 %v429_v63, %v697_v33  ;;  %v446_v21 = vmul.f32 %v430_v8, %v699_v36 }
  0x5b   :  { %v447_v22 = vmul.f32 %v431_v53, %v701_v39  ;;  %v448_v24 = vmul.f32 %v432_v9, %v703_v44  ;;  %v449_v23 = vmul.f32 %v433_v57, %v705_v48  ;;  %v450_v25 = vmul.f32 %v434_v1, %v709_v41 }
  0x5c   :  { %v451_v26 = vmul.f32 %v435_v12, %v714_v59  ;;  %v452_v0 = vmul.f32 %v436_v14, %v717_v62  ;;  %v453_v7 = vmul.f32 %v437_v11, %v720_v16  ;;  %v454_v32 = vmul.f32 %v438_v15, %v723_v3 }
  0x5d   :  { %v455_v33 = vmul.f32 %v439_v17, %v725_v4  ;;  %v456_v36 = vmul.f32 %v440_v18, %v728_v6  ;;  %v458_v28 = vadd.f32 %v443_v5, %v442_v60  ;;  %v457_v39 = vmul.f32 %v441_v20, %v731_v10 }
  0x5e   :  { %v459_v44 = vadd.f32 %v445_v19, %v444_v13  ;;  %v460_v29 = vadd.f32 %v447_v22, %v446_v21  ;;  %v461_v48 = vadd.f32 %v449_v23, %v448_v24  ;;  %v462_v27 = vadd.f32 %v451_v26, %v450_v25 }
  0x5f   :  { %v463_v41 = vadd.f32 %v453_v7, %v452_v0  ;;  %v464_v31 = vadd.f32 %v455_v33, %v454_v32  ;;  %v465_v16 = vadd.f32 %v457_v39, %v456_v36 }
  0x60   :  { %v475_v59 = vsel %vm81_vm1, %v459_v44, %v458_v28 }
  0x61   :  { %v476_v62 = vsel %vm84_vm2, %v460_v29, %v475_v59 }
  0x62   :  { %v477_v3 = vsel %vm87_vm3, %v461_v48, %v476_v62 }
  0x63   :  { %v478_v4 = vsel %vm90_vm4, %v462_v27, %v477_v3 }
  0x64   :  { %v479_v6 = vsel %vm93_vm5, %v463_v41, %v478_v4 }
  0x65   :  { %v480_v10 = vsel %vm96_vm6, %v464_v31, %v479_v6 }
  0x66   :  { %v482_v34 = vsel %vm481_vm8, %v465_v16, %v480_v10 }
  0x67   :  { %490 = vadd.xlane.f32.xlu0 %v482_v34 }
  0xda   :  { %v491_v35 = vpop.xlane.xlu0 %490 }
  0xdb   :  { %493 = vst.msk [vmem:[%s766_s2] sm:$0xff] %vm492_vm0, %v491_v35 }
  0xdc   :  { %498 = vsyncpa [#allocation4], 1 }
  0xdd   :  { %499 = vsyncpa [#allocation6], 1 }

</bundles_post_ra>
